<compile_context>
chip_gen: v6e
topology: v6e:2x2x1
jax: 0.10.0
libtpu: 0.0.40
codegen_flags: <defaults>
</compile_context>

<pallas_src>
import functools

import jax
import jax.numpy as jnp
from jax.experimental import pallas as pl
from jax.experimental.pallas import tpu as pltpu

_LANE = 128      # TPU lane width
_SUBLANE = 8     # TPU sublane width (f32)


def _round_up(x: int, m: int) -> int:
    return ((x + m - 1) // m) * m


def _query_phys_vmem_bytes() -> int:
    """Physical VMEM per TensorCore; fall back to the smallest gen (v7x)."""
    try:
        return int(pltpu.get_tpu_info().vmem_capacity_bytes)
    except Exception:
        return 64 * 1024 * 1024


_PHYS_VMEM = _query_phys_vmem_bytes()
# Scoped VMEM we request from Mosaic: ~3/4 of physical, capped at 100 MiB.
#   v5e/v6e (128 MiB physical) -> 96 MiB;  v7x (64 MiB per TC) -> 48 MiB.
_VMEM_LIMIT = min((_PHYS_VMEM * 3) // 4, 100 * 1024 * 1024)

# Tile caps derived from the per-generation budget (bf16 operands).
if _VMEM_LIMIT >= 64 * 1024 * 1024:     # 128-MiB-VMEM generations (v5e/v6e)
    _MAX_TM, _MAX_TK = 256, 2048
else:                                   # v7x: 64 MiB physical per TC
    _MAX_TM, _MAX_TK = 256, 1024

# If the whole bf16 W1 slab fits this budget, keep it VMEM-resident for the
# entire call (single K step, single-buffered) instead of re-streaming it once
# per batch tile.
_W1_RESIDENT_BYTES = _VMEM_LIMIT // 3


def _pick_tk(d: int, max_tk: int) -> int:
    """Largest lane-multiple K tile <= max_tk that divides round_up(d, 128)."""
    d_lanes = _round_up(d, _LANE) // _LANE
    max_lanes = max(1, max_tk // _LANE)
    best = 1
    for cand in range(1, min(d_lanes, max_lanes) + 1):
        if d_lanes % cand == 0:
            best = cand
    return best * _LANE


def _pick_tm(b: int, max_tm: int) -> int:
    """8-multiple batch tile <= max_tm minimizing padded rows (Bp - B)."""
    if b <= max_tm:
        return _round_up(b, _SUBLANE)
    lo = 64 if b >= 64 else _SUBLANE     # avoid degenerate tiny tiles
    best_tm = max_tm
    best_pad = _round_up(b, best_tm) - b
    tm = max_tm - _SUBLANE
    while tm >= lo:
        pad = _round_up(b, tm) - b
        if pad < best_pad:
            best_pad, best_tm = pad, tm
        tm -= _SUBLANE
    return best_tm


def _oracle_kernel(x_ref, w1_ref, b1_ref, w2_ref, b2_ref, o_ref, acc_ref):
    """Grid = (M tiles, K tiles); K (fc1 reduction over D) is the last axis."""
    k = pl.program_id(1)

    @pl.when(k == 0)
    def _():
        acc_ref[...] = jnp.zeros_like(acc_ref)

    # fc1 partial product: bf16 (tm, tk) @ bf16 (tk, Hp), accumulated in f32.
    acc_ref[...] += jnp.dot(x_ref[...], w1_ref[...],
                            preferred_element_type=jnp.float32)

    @pl.when(k == pl.num_programs(1) - 1)
    def _():
        # Bias add + ELU stay in f32 on the accumulator (v5e has no bf16
        # VPU/EUP path for exp/select).
        h = acc_ref[...] + b1_ref[...]                       # (tm, Hp) + (1, Hp)
        # ELU (alpha=1); clamp the dead branch so exp never overflows.
        h = jnp.where(h > 0.0, h, jnp.exp(jnp.minimum(h, 0.0)) - 1.0)
        # fc2: downcast h to bf16 only as the MXU operand; f32 accumulation.
        y = jnp.dot(h.astype(w2_ref.dtype), w2_ref[...],
                    preferred_element_type=jnp.float32)
        o_ref[...] = (y + b2_ref[...]).astype(o_ref.dtype)


def pack_oracle_params(w1, b1, w2, b2):
    """One-time parameter packing (parameter-init time, NOT per forward call).

    Takes PyTorch-layout Linear params  w1:(H, D)  b1:(H,)  w2:(O, H)  b2:(O,)
    and returns lane-dense, pre-transposed, zero-padded operands:
        w1p:(Dp, Hp) bf16   b1p:(1, Hp) f32   w2p:(Hp, Op) bf16   b2p:(1, Op) f32
    Zero padding is exact: padded D rows / H cols / O cols contribute 0 and
    ELU(0) = 0, so padded hidden lanes stay 0 through fc2.
    """
    H, D = w1.shape
    O = w2.shape[0]
    Hp = _round_up(H, _LANE)
    Op = _round_up(O, _LANE)
    Dp = _round_up(D, _LANE)

    tk = _pick_tk(D, _MAX_TK)
    # W1 residency: collapse to a single K step when the whole bf16 slab fits
    # the budget (and the x tile stays reasonable).
    if Dp * Hp * 2 <= _W1_RESIDENT_BYTES and Dp <= 2 * _MAX_TK:
        tk = Dp

    w1p = jnp.zeros((Dp, Hp), jnp.bfloat16).at[:D, :H].set(
        w1.T.astype(jnp.bfloat16))
    b1p = jnp.zeros((1, Hp), jnp.float32).at[0, :H].set(b1.astype(jnp.float32))
    w2p = jnp.zeros((Hp, Op), jnp.bfloat16).at[:H, :O].set(
        w2.T.astype(jnp.bfloat16))
    b2p = jnp.zeros((1, Op), jnp.float32).at[0, :O].set(b2.astype(jnp.float32))

    meta = {"tk": tk, "out_size": O, "in_features": D}
    return (w1p, b1p, w2p, b2p), meta


def _block_spec(shape, index_map, buffer_count=None):
    if buffer_count is None:
        return pl.BlockSpec(shape, index_map)
    return pl.BlockSpec(shape, index_map,
                        pipeline_mode=pl.Buffered(buffer_count))


@functools.partial(jax.jit, static_argnames=("tk", "out_size"))
def _oracle_forward(x, w1p, b1p, w2p, b2p, *, tk, out_size):
    B = x.shape[0]
    D = x.shape[1] * x.shape[2]
    Dp, Hp = w1p.shape
    Op = w2p.shape[1]
    assert D <= Dp and Dp % tk == 0

    tm = _pick_tm(B, _MAX_TM)
    Bp = _round_up(B, tm)
    n_m, n_k = Bp // tm, Dp // tk

    # bf16 x; pad only what is needed (row pad along B, and a D pad only when
    # D is not already lane-aligned -- tk always divides round_up(D, 128)).
    x2 = x.reshape(B, D).astype(jnp.bfloat16)
    if Bp != B or Dp != D:
        x2 = jnp.pad(x2, ((0, Bp - B), (0, Dp - D)))

    # Operands whose block index never changes are single-buffered to reclaim
    # the double-buffer VMEM (w1 too, when resident / single K step).
    const_buf = 1
    w1_buf = 1 if n_k == 1 else None
    # TODO(synk): sweep pl.Buffered(3) on the streamed x / w1 blocks per
    # generation once bf16 makes the kernel memory-bound (v5e/v6e).

    w1_bytes = Dp * Hp * 2 if n_k == 1 else n_m * Dp * Hp * 2
    cost = pl.CostEstimate(
        flops=2 * Bp * Dp * Hp + 2 * Bp * Hp * Op,
        transcendentals=Bp * Hp,
        bytes_accessed=Bp * Dp * 2 + w1_bytes + Hp * Op * 2 + Bp * Op * 4,
    )

    out = pl.pallas_call(
        _oracle_kernel,
        out_shape=jax.ShapeDtypeStruct((Bp, Op), jnp.float32),
        grid_spec=pltpu.PrefetchScalarGridSpec(
            num_scalar_prefetch=0,
            grid=(n_m, n_k),
            in_specs=[
                _block_spec((tm, tk), lambda i, k: (i, k)),             # x tile
                _block_spec((tk, Hp), lambda i, k: (k, 0), w1_buf),     # W1
                _block_spec((1, Hp), lambda i, k: (0, 0), const_buf),   # b1
                _block_spec((Hp, Op), lambda i, k: (0, 0), const_buf),  # W2
                _block_spec((1, Op), lambda i, k: (0, 0), const_buf),   # b2
            ],
            out_specs=pl.BlockSpec((tm, Op), lambda i, k: (i, 0)),
            scratch_shapes=[pltpu.VMEM((tm, Hp), jnp.float32)],  # fc1 accum
        ),
        compiler_params=pltpu.CompilerParams(
            # Batch tiles independent -> megacore-parallel; D reduction stays
            # sequential.
            dimension_semantics=("parallel", "arbitrary"),
            vmem_limit_bytes=_VMEM_LIMIT,
        ),
        cost_estimate=cost,
    )(x2, w1p, b1p, w2p, b2p)

    return out[:B, :out_size]


def sequence_oracle_forward(x, packed_params):
    """x: (B, seqlen, vocab); packed_params from pack_oracle_params()."""
    (w1p, b1p, w2p, b2p), meta = packed_params
    assert x.shape[1] * x.shape[2] == meta["in_features"]
    return _oracle_forward(x, w1p, b1p, w2p, b2p,
                           tk=meta["tk"], out_size=meta["out_size"])


def reference_forward(x, w1, b1, w2, b2):
    """Pure-JAX f32 reference of the PyTorch forward (PyTorch param layout)."""
    B = x.shape[0]
    xf = x.reshape(B, -1)
    h = xf @ w1.T + b1
    h = jnp.where(h > 0, h, jnp.exp(h) - 1.0)
    return h @ w2.T + b2


if __name__ == "__main__":
    # Small shapes consistent with the module: seqlen=8, vocab=16 -> D=128.
    batch, seqlen, vocab = 2, 8, 16
    hidden, out_size = 32, 2
    D = seqlen * vocab

    key = jax.random.PRNGKey(0)
    kx, kw1, kb1, kw2, kb2 = jax.random.split(key, 5)

    # Deterministic synthetic parameters (PyTorch Linear shapes: (out, in)).
    x = jax.random.normal(kx, (batch, seqlen, vocab), dtype=jnp.float32)
    w1 = jax.random.normal(kw1, (hidden, D), dtype=jnp.float32) * 0.05
    b1 = jax.random.normal(kb1, (hidden,), dtype=jnp.float32) * 0.05
    w2 = jax.random.normal(kw2, (out_size, hidden), dtype=jnp.float32) * 0.05
    b2 = jax.random.normal(kb2, (out_size,), dtype=jnp.float32) * 0.05

    # One-time parameter packing (transpose + lane padding + bf16), then run.
    packed = pack_oracle_params(w1, b1, w2, b2)
    y = sequence_oracle_forward(x, packed)
    y = jax.block_until_ready(y)

    y_ref = reference_forward(x, w1, b1, w2, b2)
    assert y.shape == (batch, out_size), y.shape
    # Tolerance sized for bf16 MXU operands with f32 accumulation.
    max_err = float(jnp.max(jnp.abs(y - y_ref)))
    assert jnp.allclose(y, y_ref, atol=2e-2, rtol=2e-2), (
        "mismatch vs reference", max_err)

    print("KERNEL_OK")
</pallas_src>

<mosaic_0001>
module attributes {stable_mosaic.version = 11 : i64} {
  func.func @_oracle_kernel(%arg0: i32, %arg1: i32, %arg2: memref<8x128xbf16, #tpu.memory_space<vmem>>, %arg3: memref<128x128xbf16, #tpu.memory_space<vmem>>, %arg4: memref<1x128xf32, #tpu.memory_space<vmem>>, %arg5: memref<128x128xbf16, #tpu.memory_space<vmem>>, %arg6: memref<1x128xf32, #tpu.memory_space<vmem>>, %arg7: memref<8x128xf32, #tpu.memory_space<vmem>>, %arg8: memref<8x128xf32, #tpu.memory_space<vmem>>) attributes {dimension_semantics = [#tpu.dimension_semantics<parallel>, #tpu.dimension_semantics<arbitrary>], iteration_bounds = array<i64: 1, 1>, scalar_prefetch = 0 : i64, scratch_operands = 1 : i64, tpu.core_type = #tpu.core_type<tc>, window_params = [{transform_indices = @transform_0, window_bounds = array<i64: 8, 128>}, {pipeline_mode = #tpu.pipeline_mode<synchronous>, transform_indices = @transform_1, window_bounds = array<i64: 128, 128>}, {pipeline_mode = #tpu.pipeline_mode<synchronous>, transform_indices = @transform_2, window_bounds = array<i64: 1, 128>}, {pipeline_mode = #tpu.pipeline_mode<synchronous>, transform_indices = @transform_3, window_bounds = array<i64: 128, 128>}, {pipeline_mode = #tpu.pipeline_mode<synchronous>, transform_indices = @transform_4, window_bounds = array<i64: 1, 128>}, {transform_indices = @transform_5, window_bounds = array<i64: 8, 128>}]} {
    %c0_i32 = arith.constant 0 : i32
    %0 = arith.cmpi eq, %arg1, %c0_i32 : i32
    %1 = arith.extui %0 : i1 to i32
    %c0_i32_0 = arith.constant 0 : i32
    %2 = arith.cmpi ne, %1, %c0_i32_0 : i32
    scf.if %2 {
      %cst_10 = arith.constant 0.000000e+00 : f32
      %12 = vector.broadcast %cst_10 : f32 to vector<8x128xf32>
      %c0_11 = arith.constant 0 : index
      %c0_12 = arith.constant 0 : index
      %13 = vector.load %arg8[%c0_11, %c0_12] : memref<8x128xf32, #tpu.memory_space<vmem>>, vector<8x128xf32>
      tpu.vector_store %arg8[%c0_11, %c0_12], %12 {strides = array<i32>} : memref<8x128xf32, #tpu.memory_space<vmem>>, vector<8x128xf32>,
    } else {
    }
    %c0 = arith.constant 0 : index
    %c0_1 = arith.constant 0 : index
    %3 = vector.load %arg8[%c0, %c0_1] : memref<8x128xf32, #tpu.memory_space<vmem>>, vector<8x128xf32>
    %c0_2 = arith.constant 0 : index
    %c0_3 = arith.constant 0 : index
    %4 = vector.load %arg2[%c0_2, %c0_3] : memref<8x128xbf16, #tpu.memory_space<vmem>>, vector<8x128xbf16>
    %c0_4 = arith.constant 0 : index
    %c0_5 = arith.constant 0 : index
    %5 = vector.load %arg3[%c0_4, %c0_5] : memref<128x128xbf16, #tpu.memory_space<vmem>>, vector<128x128xbf16>
    %cst = arith.constant dense<0.000000e+00> : vector<8x128xf32>
    %6 = tpu.matmul %4, %5, %cst {dimension_numbers = #tpu.dot_dimension_numbers<[1], [0], [0], [1], [0, 0, 1, 1], [], []>} : vector<8x128xbf16>, vector<128x128xbf16>, vector<8x128xf32> -> vector<8x128xf32>
    %7 = arith.addf %3, %6 : vector<8x128xf32>
    %c0_6 = arith.constant 0 : index
    %c0_7 = arith.constant 0 : index
    %8 = vector.load %arg8[%c0_6, %c0_7] : memref<8x128xf32, #tpu.memory_space<vmem>>, vector<8x128xf32>
    tpu.vector_store %arg8[%c0_6, %c0_7], %7 {strides = array<i32>} : memref<8x128xf32, #tpu.memory_space<vmem>>, vector<8x128xf32>,
    %c0_i32_8 = arith.constant 0 : i32
    %9 = arith.cmpi eq, %arg1, %c0_i32_8 : i32
    %10 = arith.extui %9 : i1 to i32
    %c0_i32_9 = arith.constant 0 : i32
    %11 = arith.cmpi ne, %10, %c0_i32_9 : i32
    scf.if %11 {
      %c0_10 = arith.constant 0 : index
      %c0_11 = arith.constant 0 : index
      %12 = vector.load %arg8[%c0_10, %c0_11] : memref<8x128xf32, #tpu.memory_space<vmem>>, vector<8x128xf32>
      %c0_12 = arith.constant 0 : index
      %c0_13 = arith.constant 0 : index
      %13 = vector.load %arg4[%c0_12, %c0_13] : memref<1x128xf32, #tpu.memory_space<vmem>>, vector<1x128xf32>
      %14 = vector.broadcast %13 : vector<1x128xf32> to vector<8x128xf32>
      %15 = arith.addf %12, %14 : vector<8x128xf32>
      %cst_14 = arith.constant 0.000000e+00 : f32
      %16 = vector.broadcast %cst_14 : f32 to vector<8x128xf32>
      %17 = arith.cmpf ogt, %15, %16 : vector<8x128xf32>
      %cst_15 = arith.constant 0.000000e+00 : f32
      %18 = vector.broadcast %cst_15 : f32 to vector<8x128xf32>
      %19 = arith.minimumf %15, %18 : vector<8x128xf32>
      %20 = math.exp %19 : vector<8x128xf32>
      %cst_16 = arith.constant 1.000000e+00 : f32
      %21 = vector.broadcast %cst_16 : f32 to vector<8x128xf32>
      %22 = arith.subf %20, %21 : vector<8x128xf32>
      %23 = arith.select %17, %15, %22 : vector<8x128xi1>, vector<8x128xf32>
      %24 = arith.truncf %23 : vector<8x128xf32> to vector<8x128xbf16>
      %c0_17 = arith.constant 0 : index
      %c0_18 = arith.constant 0 : index
      %25 = vector.load %arg5[%c0_17, %c0_18] : memref<128x128xbf16, #tpu.memory_space<vmem>>, vector<128x128xbf16>
      %cst_19 = arith.constant dense<0.000000e+00> : vector<8x128xf32>
      %26 = tpu.matmul %24, %25, %cst_19 {dimension_numbers = #tpu.dot_dimension_numbers<[1], [0], [0], [1], [0, 0, 1, 1], [], []>} : vector<8x128xbf16>, vector<128x128xbf16>, vector<8x128xf32> -> vector<8x128xf32>
      %c0_20 = arith.constant 0 : index
      %c0_21 = arith.constant 0 : index
      %27 = vector.load %arg6[%c0_20, %c0_21] : memref<1x128xf32, #tpu.memory_space<vmem>>, vector<1x128xf32>
      %28 = vector.broadcast %27 : vector<1x128xf32> to vector<8x128xf32>
      %29 = arith.addf %26, %28 : vector<8x128xf32>
      %c0_22 = arith.constant 0 : index
      %c0_23 = arith.constant 0 : index
      %30 = vector.load %arg7[%c0_22, %c0_23] : memref<8x128xf32, #tpu.memory_space<vmem>>, vector<8x128xf32>
      tpu.vector_store %arg7[%c0_22, %c0_23], %29 {strides = array<i32>} : memref<8x128xf32, #tpu.memory_space<vmem>>, vector<8x128xf32>,
    } else {
    }
    return
  }
  func.func @transform_0(%arg0: i32, %arg1: i32) -> (i32, i32) {
    %c0_i32 = arith.constant 0 : i32
    return %arg0, %arg1 : i32, i32
  }
  func.func @transform_1(%arg0: i32, %arg1: i32) -> (i32, i32) {
    %c0_i32 = arith.constant 0 : i32
    %c0_i32_0 = arith.constant 0 : i32
    return %arg1, %c0_i32 : i32, i32
  }
  func.func @transform_2(%arg0: i32, %arg1: i32) -> (i32, i32) {
    %c0_i32 = arith.constant 0 : i32
    %c0_i32_0 = arith.constant 0 : i32
    %c0_i32_1 = arith.constant 0 : i32
    return %c0_i32, %c0_i32_0 : i32, i32
  }
  func.func @transform_3(%arg0: i32, %arg1: i32) -> (i32, i32) {
    %c0_i32 = arith.constant 0 : i32
    %c0_i32_0 = arith.constant 0 : i32
    %c0_i32_1 = arith.constant 0 : i32
    return %c0_i32, %c0_i32_0 : i32, i32
  }
  func.func @transform_4(%arg0: i32, %arg1: i32) -> (i32, i32) {
    %c0_i32 = arith.constant 0 : i32
    %c0_i32_0 = arith.constant 0 : i32
    %c0_i32_1 = arith.constant 0 : i32
    return %c0_i32, %c0_i32_0 : i32, i32
  }
  func.func @transform_5(%arg0: i32, %arg1: i32) -> (i32, i32) {
    %c0_i32 = arith.constant 0 : i32
    %c0_i32_0 = arith.constant 0 : i32
    return %arg0, %c0_i32 : i32, i32
  }
}

</mosaic_0001>

<bundles_post_ra>
// kernel: _oracle_forward.1
= control target key start
LH: loop header
LB: loop body
LE: loop exit
PB: predicated region body
PF: predicated region fallthrough
CT: control target
= control target key end

     0   :  { %10 = vsyncpa [#allocation4], 0  ;;  %s498_s0 = inlined_call_operand.vmem [shape: bf16[8,128], index: 0, kind: input, shape index: {}]   ;;  %s499_s1 = inlined_call_operand.hbm [shape: bf16[128,128], index: 1, kind: input, shape index: {}]   ;;  %s500_s2 = inlined_call_operand.vmem [shape: f32[1,128], index: 2, kind: input, shape index: {}]   ;;  %s501_s3 = inlined_call_operand.hbm [shape: bf16[128,128], index: 3, kind: input, shape index: {}]   ;;  %s502_s4 = inlined_call_operand.vmem [shape: f32[1,128], index: 4, kind: input, shape index: {}]   ;;  %s503_s5 = inlined_call_operand.vmem [shape: f32[8,128], index: 5, kind: output, shape index: {}]  }
   0x1   :  { %11 = vsyncpa [#allocation6], 0  ;;  %s444_s18 = smov [#allocation3]  }
   0x2   :  { %s19_s19 = sshll.u32 %s444_s18, 4  ;;  %s20_s19 = int_to_ptr.vmem [resolvable:$true] %s19_s19 }
   0x3   :  { %s408_s20 = scalar_lea.vmem %s20_s19, 1024  ;;  %p413_p1 = scmp.lt.s32.totalorder %s20_s19, %s20_s19 }
   0x4   :  { %p409_p0 = scmp.ne.s32.totalorder %s20_s19, %s408_s20  ;;  %p414_p2 = scmp.lt.s32.totalorder %s408_s20, %s408_s20 }
   0x6   :  { %p415_p3 = por %p414_p2, %p413_p1 }
   0x8   :  { %p416_p4 = pnand %p415_p3, %p409_p0 }
   0xa   :  { %419 = shalt.err (!%p416_p4)
}
   0xb   :  { %s445_s21 = smov 64   ;;  %s446_s22 = smov 4  }
   0xc   :  { %25 = dma.hbm_to_vmem [thread:$0]  %s499_s1, 1024, %s20_s19, [#allocation4], %s445_s21, %s445_s21, %s446_s22  }
   0xd   :  { %s447_s25 = smov [#allocation5]  }
   0xe   :  { %s33_s26 = sshll.u32 %s447_s25, 4  ;;  %s34_s26 = int_to_ptr.vmem [resolvable:$true] %s33_s26 }
   0xf   :  { %s428_s27 = scalar_lea.vmem %s34_s26, 1024  ;;  %p433_p6 = scmp.lt.s32.totalorder %s34_s26, %s34_s26 }
  0x10   :  { %p429_p5 = scmp.ne.s32.totalorder %s34_s26, %s428_s27  ;;  %p434_p7 = scmp.lt.s32.totalorder %s428_s27, %s428_s27 }
  0x12   :  { %p435_p8 = por %p434_p7, %p433_p6 }
  0x14   :  { %p436_p9 = pnand %p435_p8, %p429_p5 }
  0x16   :  { %439 = shalt.err (!%p436_p9)
}
  0x17   :  { %39 = dma.hbm_to_vmem [thread:$0]  %s501_s3, 1024, %s34_s26, [#allocation6], %s445_s21, %s445_s21, %s446_s22  }
  0x18   :  { %440 = dma.done.wait [#allocation4], 1024  }
  0x19   :  { %441 = vsyncadd [#allocation4], 4294966272 }
  0x1a   :  { %442 = dma.done.wait [#allocation6], 1024  }
  0x1b   :  { %443 = vsyncadd [#allocation6], 4294966272  ;;  %v448_v0 = vmov 0.0   ;;  %vm449_vm0 = vmmov 0   ;;  %v382_v1 = vld [vmem:[#allocation3 + $0x38] sm:$0xff]   ;;  %v383_v2 = vld [vmem:[#allocation3 + $0x30] sm:$0xff]  }
  0x1c   :  { %336 = vmatprep.subr.bf16.mxu0 %v448_v0  ;;  %352 = vmatprep.mubr.msk.bf16.mxu0 %vm449_vm0, %v448_v0  ;;  %v384_v3 = vld [vmem:[#allocation3 + $0x28] sm:$0xff]   ;;  %v385_v4 = vld [vmem:[#allocation3 + $0x20] sm:$0xff]   ;;  %v390_v5 = vld [vmem:[#allocation5 + $0x38] sm:$0xff]  }
  0x1d   :  { %356 = vmatprep.subr.bf16.mxu1 %v448_v0  ;;  %372 = vmatprep.mubr.msk.bf16.mxu1 %vm449_vm0, %v448_v0  ;;  %v391_v6 = vld [vmem:[#allocation5 + $0x30] sm:$0xff]   ;;  %v386_v7 = vld [vmem:[#allocation3 + $0x18] sm:$0xff]   ;;  %v388_v9 = vld [vmem:[#allocation3 + $0x8] sm:$0xff]  }
  0x1e   :  { %337 = vmatpush3.bf16.msra.mxu0 %v382_v1  ;;  %357 = vmatpush3.bf16.msra.mxu1 %v390_v5  ;;  %v387_v8 = vld [vmem:[#allocation3 + $0x10] sm:$0xff]   ;;  %v389_v10 = vld [vmem:[#allocation3] sm:$0xff]   ;;  %v392_v12 = vld [vmem:[#allocation5 + $0x28] sm:$0xff]  }
  0x1f   :  { %338 = vmatprep.subr.bf16.mxu0 %v448_v0  ;;  %358 = vmatprep.subr.bf16.mxu1 %v448_v0  ;;  %v55_v11 = vld [vmem:[%s498_s0] sm:$0xf]  ;;  %v394_v14 = vld [vmem:[#allocation5 + $0x18] sm:$0xff]   ;;  %v395_v15 = vld [vmem:[#allocation5 + $0x10] sm:$0xff]  }
  0x20   :  { %v393_v13 = vld [vmem:[#allocation5 + $0x20] sm:$0xff]   ;;  %v396_v16 = vld [vmem:[#allocation5 + $0x8] sm:$0xff]  }
  0x21   :  { %v397_v17 = vld [vmem:[#allocation5] sm:$0xff]  }
  0x22   :  { %339 = vmatpush3.bf16.msra.mxu0 %v383_v2  ;;  %359 = vmatpush3.bf16.msra.mxu1 %v391_v6  ;;  %v307_v18 = vld [vmem:[%s500_s2] ss:$0 sm:$0xff] }
  0x23   :  { %340 = vmatprep.subr.bf16.mxu0 %v448_v0  ;;  %360 = vmatprep.subr.bf16.mxu1 %v448_v0  ;;  %v309_v30 = vld [vmem:[%s502_s4] ss:$0 sm:$0xff] }
  0x26   :  { %341 = vmatpush3.bf16.msra.mxu0 %v384_v3  ;;  %361 = vmatpush3.bf16.msra.mxu1 %v392_v12 }
  0x27   :  { %342 = vmatprep.subr.bf16.mxu0 %v448_v0  ;;  %362 = vmatprep.subr.bf16.mxu1 %v448_v0 }
  0x2a   :  { %343 = vmatpush3.bf16.msra.mxu0 %v385_v4  ;;  %363 = vmatpush3.bf16.msra.mxu1 %v393_v13 }
  0x2b   :  { %344 = vmatprep.subr.bf16.mxu0 %v448_v0  ;;  %364 = vmatprep.subr.bf16.mxu1 %v448_v0 }
  0x2e   :  { %345 = vmatpush3.bf16.msra.mxu0 %v386_v7  ;;  %365 = vmatpush3.bf16.msra.mxu1 %v394_v14 }
  0x2f   :  { %346 = vmatprep.subr.bf16.mxu0 %v448_v0  ;;  %366 = vmatprep.subr.bf16.mxu1 %v448_v0 }
  0x32   :  { %347 = vmatpush3.bf16.msra.mxu0 %v387_v8  ;;  %367 = vmatpush3.bf16.msra.mxu1 %v395_v15 }
  0x33   :  { %348 = vmatprep.subr.bf16.mxu0 %v448_v0  ;;  %368 = vmatprep.subr.bf16.mxu1 %v448_v0 }
  0x36   :  { %349 = vmatpush3.bf16.msra.mxu0 %v388_v9  ;;  %369 = vmatpush3.bf16.msra.mxu1 %v396_v16 }
  0x37   :  { %350 = vmatprep.subr.bf16.mxu0 %v448_v0  ;;  %370 = vmatprep.subr.bf16.mxu1 %v448_v0 }
  0x3a   :  { %351 = vmatpush3.bf16.msra.mxu0 %v389_v10  ;;  %371 = vmatpush3.bf16.msra.mxu1 %v397_v17 }
  0x3d   :  { %353 = vmatmul.mubr.bf16.vlgmr.msra.gmra.mxu0 %v55_v11 }
  0xfd   :  { %v154_v19 = vpop.f32.mrf.mxu0 }
  0xfe   :  { %v173_v20 = vadd.f32 %v307_v18, %v154_v19 }
  0xff   :  { %v354_v21 = vpop.f32.mrf.mxu0 }
 0x100   :  { %v175_v22 = vmin.f32 %v173_v20, 0.0  ;;  %vm174_vm1 = vcmp.gt.f32.partialorder %v173_v20, 0.0 }
 0x101   :  { %v157_v23 = vpop.f32.mrf.mxu0 }
 0x102   :  { %v176_v24 = vmul.f32 1.442695, %v175_v22 }
 0x103   :  { %v355_v25 = vpop.f32.mrf.mxu0 }
 0x104   :  { %398 = vpow2.f32 %v176_v24 }
 0x111   :  { %v399_v26 = vpop.eup %398 }
 0x112   :  { %v308_v27 = vadd.f32 -1.0, %v399_v26 }
 0x114   :  { %v179_v28 = vsel %vm174_vm1, %v173_v20, %v308_v27 }
 0x115   :  { %v180_v29 = vpack.c.bf16 %v179_v28, %v179_v28 }
 0x117   :  { %373 = vmatmul.mubr.bf16.vlgmr.msra.gmra.mxu1 %v180_v29 }
 0x1d7   :  { %v286_v31 = vpop.f32.mrf.mxu1 }
 0x1d8   :  { %v287_v32 = vadd.f32 %v309_v30, %v286_v31 }
 0x1d9   :  { %v374_v33 = vpop.f32.mrf.mxu1 }
 0x1da   :  { %292 = vst [vmem:[%s503_s5] sm:$0xff] %v287_v32 }
 0x1db   :  { %v289_v34 = vpop.f32.mrf.mxu1 }
 0x1dd   :  { %v375_v35 = vpop.f32.mrf.mxu1 }
 0x1de   :  { %297 = vsyncpa [#allocation4], 1 }
 0x1df   :  { %298 = vsyncpa [#allocation6], 1 }

</bundles_post_ra>
